<compile_context>
chip_gen: v7x
topology: tpu7x:2x2x1
jax: 0.10.0
libtpu: 0.0.40
codegen_flags: <defaults>
</compile_context>

<pallas_src>
import jax
import jax.numpy as jnp
from jax.experimental import pallas as pl
from jax.experimental.pallas import tpu as pltpu


def _nll_gather_kernel(logp_ref, tgt_ref, rowloss_ref):
    # logp_ref:    (TN, TC) log-probs in native dtype (edge tiles may be padded)
    # tgt_ref:     (TN, 1)  int32 global class indices (constant across C tiles)
    # rowloss_ref: (TN, 1)  f32 per-row -logp[target], resident across the C axis
    k = pl.program_id(1)

    @pl.when(k == 0)
    def _init():
        rowloss_ref[...] = jnp.zeros_like(rowloss_ref)

    logp = logp_ref[...].astype(jnp.float32)                      # upcast in-kernel
    tgt = tgt_ref[...]                                            # (TN, 1) int32
    tc = logp.shape[1]
    # Global column ids for this tile. Padded lanes of edge tiles get ids >= C,
    # which never match a (valid, < C) target, so any padding garbage is masked out.
    col = jax.lax.broadcasted_iota(jnp.int32, logp.shape, 1) + k * tc
    picked = jnp.where(col == tgt, logp, 0.0)                     # one-hot gather
    rowloss_ref[...] += -jnp.sum(picked, axis=1, keepdims=True)   # accumulate over C tiles


def hierarchical_softmax_loss(outputs, labels, level_labels, *, tn_max=512, tc_max=2048):
    """Pallas equivalent of HierarchicalSoftmaxLoss.forward.

    `labels` is unused (matches the PyTorch module). Returns a scalar float32.
    """
    del labels
    n, c = outputs.shape
    targets = level_labels[:, -1].astype(jnp.int32).reshape(n, 1)  # last hierarchy level

    # Full dim if it fits (always a legal block shape), else a fixed aligned tile.
    tn = n if n <= tn_max else tn_max          # tn_max is sublane-aligned (mult. of 8)
    tc = c if c <= tc_max else tc_max          # tc_max is lane-aligned (mult. of 128)
    grid = (pl.cdiv(n, tn), pl.cdiv(c, tc))    # edge tiles handled by in-kernel masking

    row_nll = pl.pallas_call(
        _nll_gather_kernel,
        out_shape=jax.ShapeDtypeStruct((n, 1), jnp.float32),
        grid_spec=pltpu.PrefetchScalarGridSpec(
            num_scalar_prefetch=0,
            grid=grid,
            in_specs=[
                pl.BlockSpec((tn, tc), lambda i, k: (i, k)),   # log-prob tile stream
                pl.BlockSpec((tn, 1), lambda i, k: (i, 0)),    # targets: one fetch per N tile
            ],
            out_specs=pl.BlockSpec((tn, 1), lambda i, k: (i, 0)),  # resident accumulator
        ),
        compiler_params=pltpu.CompilerParams(
            dimension_semantics=("parallel", "arbitrary")),
    )(outputs, targets)

    # NLLLoss(reduction='mean'): O(N) finalize outside the kernel.
    return jnp.sum(row_nll[:, 0]) / jnp.float32(n)


if __name__ == "__main__":
    key = jax.random.PRNGKey(0)
    k1, k2 = jax.random.split(key)

    # Small shapes: batch=8 rows, 16 leaf classes, 3 hierarchy levels.
    N, C, L = 8, 16, 3
    logits = jax.random.normal(k1, (N, C), dtype=jnp.float32)
    outputs = jax.nn.log_softmax(logits, axis=-1)                 # NLLLoss expects log-probs
    level_labels = jax.random.randint(k2, (N, L), 0, C, dtype=jnp.int32)
    labels = level_labels[:, -1]                                  # unused by forward

    loss = hierarchical_softmax_loss(outputs, labels, level_labels)
    jax.block_until_ready(loss)

    ref = -jnp.mean(outputs[jnp.arange(N), level_labels[:, -1]])
    assert jnp.allclose(loss, ref, rtol=1e-5, atol=1e-6), (loss, ref)

    # Second check: exercises the multi-tile path with padded edge tiles
    # (N and C not multiples of the tile sizes).
    N2, C2 = 20, 300
    k3, k4 = jax.random.split(k2)
    logits2 = jax.random.normal(k3, (N2, C2), dtype=jnp.float32)
    outputs2 = jax.nn.log_softmax(logits2, axis=-1)
    level_labels2 = jax.random.randint(k4, (N2, L), 0, C2, dtype=jnp.int32)
    loss2 = hierarchical_softmax_loss(
        outputs2, level_labels2[:, -1], level_labels2, tn_max=8, tc_max=128)
    jax.block_until_ready(loss2)

    ref2 = -jnp.mean(outputs2[jnp.arange(N2), level_labels2[:, -1]])
    assert jnp.allclose(loss2, ref2, rtol=1e-5, atol=1e-6), (loss2, ref2)

    print("KERNEL_OK")
</pallas_src>

<mosaic_0001>
module attributes {stable_mosaic.version = 11 : i64} {
  func.func @_nll_gather_kernel(%arg0: i32, %arg1: i32, %arg2: memref<8x16xf32, #tpu.memory_space<vmem>>, %arg3: memref<8x1xi32, #tpu.memory_space<vmem>>, %arg4: memref<8x1xf32, #tpu.memory_space<vmem>>) attributes {dimension_semantics = [#tpu.dimension_semantics<parallel>, #tpu.dimension_semantics<arbitrary>], iteration_bounds = array<i64: 1, 1>, scalar_prefetch = 0 : i64, scratch_operands = 0 : i64, tpu.core_type = #tpu.core_type<tc>, window_params = [{transform_indices = @transform_0, window_bounds = array<i64: 8, 16>}, {transform_indices = @transform_1, window_bounds = array<i64: 8, 1>}, {transform_indices = @transform_2, window_bounds = array<i64: 8, 1>}]} {
    %c0_i32 = arith.constant 0 : i32
    %0 = arith.cmpi eq, %arg1, %c0_i32 : i32
    %1 = arith.extui %0 : i1 to i32
    %c0_i32_0 = arith.constant 0 : i32
    %2 = arith.cmpi ne, %1, %c0_i32_0 : i32
    scf.if %2 {
      %cst_10 = arith.constant 0.000000e+00 : f32
      %20 = vector.broadcast %cst_10 : f32 to vector<8x1xf32>
      %c0_11 = arith.constant 0 : index
      %c0_12 = arith.constant 0 : index
      %21 = vector.load %arg4[%c0_11, %c0_12] : memref<8x1xf32, #tpu.memory_space<vmem>>, vector<8x1xf32>
      tpu.vector_store %arg4[%c0_11, %c0_12], %20 {strides = array<i32>} : memref<8x1xf32, #tpu.memory_space<vmem>>, vector<8x1xf32>,
    } else {
    }
    %c0 = arith.constant 0 : index
    %c0_1 = arith.constant 0 : index
    %3 = vector.load %arg2[%c0, %c0_1] : memref<8x16xf32, #tpu.memory_space<vmem>>, vector<8x16xf32>
    %c0_2 = arith.constant 0 : index
    %c0_3 = arith.constant 0 : index
    %4 = vector.load %arg3[%c0_2, %c0_3] : memref<8x1xi32, #tpu.memory_space<vmem>>, vector<8x1xi32>
    %5 = tpu.iota {dimensions = array<i32: 1>} : vector<8x16xi32>
    %c16_i32 = arith.constant 16 : i32
    %6 = arith.muli %arg1, %c16_i32 : i32
    %7 = vector.broadcast %6 : i32 to vector<8x16xi32>
    %8 = arith.addi %5, %7 : vector<8x16xi32>
    %9 = vector.broadcast %4 : vector<8x1xi32> to vector<8x16xi32>
    %10 = arith.cmpi eq, %8, %9 : vector<8x16xi32>
    %cst = arith.constant 0.000000e+00 : f32
    %11 = vector.broadcast %cst : f32 to vector<8x16xf32>
    %12 = arith.select %10, %3, %11 : vector<8x16xi1>, vector<8x16xf32>
    %c0_4 = arith.constant 0 : index
    %c0_5 = arith.constant 0 : index
    %13 = vector.load %arg4[%c0_4, %c0_5] : memref<8x1xf32, #tpu.memory_space<vmem>>, vector<8x1xf32>
    %cst_6 = arith.constant dense<0.000000e+00> : vector<8xf32>
    %14 = vector.multi_reduction <add>, %12, %cst_6 [1] : vector<8x16xf32> to vector<8xf32>
    %15 = vector.shape_cast %14 : vector<8xf32> to vector<8x1xf32>
    %cst_7 = arith.constant 0.000000e+00 : f32
    %16 = vector.broadcast %cst_7 : f32 to vector<8x1xf32>
    %17 = arith.subf %16, %15 : vector<8x1xf32>
    %18 = arith.addf %13, %17 : vector<8x1xf32>
    %c0_8 = arith.constant 0 : index
    %c0_9 = arith.constant 0 : index
    %19 = vector.load %arg4[%c0_8, %c0_9] : memref<8x1xf32, #tpu.memory_space<vmem>>, vector<8x1xf32>
    tpu.vector_store %arg4[%c0_8, %c0_9], %18 {strides = array<i32>} : memref<8x1xf32, #tpu.memory_space<vmem>>, vector<8x1xf32>,
    return
  }
  func.func @transform_0(%arg0: i32, %arg1: i32) -> (i32, i32) {
    %c0_i32 = arith.constant 0 : i32
    return %arg0, %arg1 : i32, i32
  }
  func.func @transform_1(%arg0: i32, %arg1: i32) -> (i32, i32) {
    %c0_i32 = arith.constant 0 : i32
    %c0_i32_0 = arith.constant 0 : i32
    return %arg0, %c0_i32 : i32, i32
  }
  func.func @transform_2(%arg0: i32, %arg1: i32) -> (i32, i32) {
    %c0_i32 = arith.constant 0 : i32
    %c0_i32_0 = arith.constant 0 : i32
    return %arg0, %c0_i32 : i32, i32
  }
}

</mosaic_0001>

<bundles_post_ra>
// kernel: tpu_custom_call.1
= control target key start
LH: loop header
LB: loop body
LE: loop exit
PB: predicated region body
PF: predicated region fallthrough
CT: control target
= control target key end

     0   :  { %v45_v0 = vmov 0   ;;  %vm15_vm0 = vcmask 7168   ;;  %v46_v2 = vmov 0.0   ;;  %v19_v3 = vlaneseq  ;;  %s79_s1 = inlined_call_operand.vmem [shape: s32[8,1], index: 1, kind: input, shape index: {}]   ;;  %s80_s2 = inlined_call_operand.vmem [shape: f32[8,1], index: 2, kind: output, shape index: {}]   ;;  %s81_s0 = inlined_call_operand.vmem [shape: f32[8,16], index: 0, kind: input, shape index: {}]  }
   0x1   :  { %44 = vset.pattern.permute.xlu0 %v45_v0  ;;  %v18_v1 = vld [vmem:[%s79_s1] sm:$0xff]  ;;  %16 = vst.msk [vmem:[%s80_s2] sm:$0xff] %vm15_vm0, %v46_v2  ;;  %vm30_vm1 = vcmask 130048  }
   0x2   :  { %25 = vperm.xlu0 %44, %v18_v1   ;;  %v20_v4 = vand.u32 127, %v19_v3  ;;  %v17_v5 = vld [vmem:[%s81_s0] sm:$0xff] }
   0x8   :  { %v29_v9 = vld [vmem:[%s80_s2] sm:$0xff] }
  0x81   :  { %v26_v6 = vpop.permute.xlu0 %25 }
  0x82   :  { %vm27_vm2 = vcmp.eq.s32.totalorder %v20_v4, %v26_v6 }
  0x83   :  { %v28_v7 = vsel %vm27_vm2, %v17_v5, 0.0 }
  0x84   :  { %v31_v8 = vsel %vm30_vm1, %v28_v7, 0.0 }
  0x85   :  { %32 = vadd.xlane.f32.xlu0 %v31_v8 }
 0x112   :  { %v33_v10 = vpop.xlane.xlu0 %32 }
 0x113   :  { %v34_v11 = vsub.f32 0.0, %v33_v10 }
 0x115   :  { %v35_v12 = vadd.f32 %v34_v11, %v29_v9 }
 0x117   :  { %37 = vst.msk [vmem:[%s80_s2] sm:$0xff] %vm15_vm0, %v35_v12 }

</bundles_post_ra>
